<compile_context>
chip_gen: v7x
topology: tpu7x:2x2x1
jax: 0.10.0
libtpu: 0.0.40
codegen_flags: <defaults>
</compile_context>

<pallas_src>
import functools
import math

import jax
import jax.numpy as jnp
from jax.experimental import pallas as pl
from jax.experimental.pallas import tpu as pltpu


def _make_pe_table(max_len: int, dim: int) -> jnp.ndarray:
    """Deterministic sinusoidal table, identical to the PyTorch __init__ (odd-dim safe)."""
    position = jnp.arange(0.0, max_len, dtype=jnp.float32)[:, None]            # (L, 1)
    div_term = jnp.exp(jnp.arange(0.0, dim, 2, dtype=jnp.float32)
                       * -(math.log(10000.0) / dim))                            # (ceil(dim/2),)
    angles = position * div_term                                                # (L, ceil(dim/2))
    pe = jnp.zeros((max_len, dim), dtype=jnp.float32)
    pe = pe.at[:, 0::2].set(jnp.sin(angles))                                    # ceil(dim/2) cols
    pe = pe.at[:, 1::2].set(jnp.cos(angles[:, : dim // 2]))                     # floor(dim/2) cols
    return pe                                                                   # (L, dim)


def _pos_enc_kernel(emb_ref, pe_ref, out_ref, *, scale):
    # emb_ref/out_ref: (TS, batch, dim) tiles; pe_ref: (TS, dim) tile.
    emb = emb_ref[...].astype(jnp.float32)
    pe = pe_ref[...].astype(jnp.float32)[:, None, :]        # broadcast over batch
    out_ref[...] = (emb * scale + pe).astype(out_ref.dtype)


def _round_up8(x: int) -> int:
    return max(8, ((x + 7) // 8) * 8)


def _pick_seq_tile(seq_len: int, batch: int, dim: int, emb_bytes: int) -> int:
    """Seq-tile rows so the double-buffered per-step footprint
    (2x emb + 2x out + 2x pe + f32 compute temps) stays ~20 MiB, which is
    comfortable on all generations (v7x has only 64 MiB VMEM per TensorCore)."""
    budget = 20 * 1024 * 1024
    per_row = (2 * 2 * batch * dim * emb_bytes   # emb + out blocks, double-buffered
               + 2 * dim * 4                     # pe block, double-buffered
               + 2 * batch * dim * 4)            # f32 compute temporaries
    rows = budget // max(1, per_row)
    rows = max(8, min(2048, rows))
    rows = (rows // 8) * 8
    if seq_len <= rows:
        # Whole seq fits one tile: split into >=2 steps so both v7x
        # TensorCores get work (neutral on 1-TC v5e/v6e).
        return min(_round_up8(seq_len // 2), rows)
    return rows


def positional_encoding(emb: jnp.ndarray,
                        pe_table: jnp.ndarray,
                        *,
                        seq_tile: int | None = None,
                        donate_emb: bool = False) -> jnp.ndarray:
    """emb: (seq_len, batch, dim); pe_table: (max_len, dim) float32 (passed untouched)."""
    seq_len, batch, dim = emb.shape
    assert pe_table.shape[0] >= seq_len and pe_table.shape[1] == dim

    emb_bytes = jnp.dtype(emb.dtype).itemsize
    if seq_tile is None:
        ts = _pick_seq_tile(seq_len, batch, dim, emb_bytes)
    else:
        ts = _round_up8(seq_tile)   # keep (8,128) block divisibility; edges are masked
    scale = float(math.sqrt(dim))

    kernel = functools.partial(_pos_enc_kernel, scale=scale)
    grid = (pl.cdiv(seq_len, ts),)

    cost = pl.CostEstimate(
        flops=2 * seq_len * batch * dim,
        transcendentals=0,
        bytes_accessed=(2 * seq_len * batch * dim * emb_bytes          # emb read + out write
                        + seq_len * dim * jnp.dtype(pe_table.dtype).itemsize),
    )

    return pl.pallas_call(
        kernel,
        out_shape=jax.ShapeDtypeStruct((seq_len, batch, dim), emb.dtype),
        grid_spec=pl.GridSpec(
            grid=grid,
            in_specs=[
                # emb: contiguous (TS, batch, dim) slab per step.
                pl.BlockSpec((ts, batch, dim), lambda s: (s, 0, 0)),
                # pe: (TS, dim); pe_table passed untouched, rows >= seq_len never stored.
                pl.BlockSpec((ts, dim), lambda s: (s, 0)),
            ],
            out_specs=pl.BlockSpec((ts, batch, dim), lambda s: (s, 0, 0)),
        ),
        compiler_params=pltpu.CompilerParams(
            dimension_semantics=("parallel",),   # shards seq tiles across v7x's 2 TCs
            vmem_limit_bytes=32 * 1024 * 1024,
        ),
        cost_estimate=cost,
        input_output_aliases=({0: 0} if donate_emb else {}),
    )(emb, pe_table)


# TODO(synk): nn.Dropout is identity in eval mode / p=0; training-mode random
# dropout (mask + 1/(1-p) scaling) is not implemented here.


if __name__ == "__main__":
    seq_len, batch, dim, max_len = 16, 2, 128, 512

    key = jax.random.PRNGKey(0)
    emb = jax.random.normal(key, (seq_len, batch, dim), dtype=jnp.float32)
    pe_table = _make_pe_table(max_len, dim)

    ref = emb * math.sqrt(dim) + pe_table[:seq_len][:, None, :]

    # 1) default tile: auto-split so the grid has >=2 steps
    out = jax.block_until_ready(positional_encoding(emb, pe_table))
    assert out.shape == emb.shape and out.dtype == emb.dtype
    assert jnp.allclose(out, ref, atol=1e-5, rtol=1e-5)

    # 2) user-supplied tile (exercises multi-step pipelined path + rounding)
    out_tiled = jax.block_until_ready(positional_encoding(emb, pe_table, seq_tile=8))
    assert jnp.allclose(out_tiled, ref, atol=1e-5, rtol=1e-5)

    # 3) bf16 activations (op is HBM-bound; halving bytes ~halves wall time)
    emb_bf16 = emb.astype(jnp.bfloat16)
    out_bf16 = jax.block_until_ready(positional_encoding(emb_bf16, pe_table))
    ref_bf16 = (emb_bf16.astype(jnp.float32) * math.sqrt(dim)
                + pe_table[:seq_len][:, None, :])
    assert out_bf16.dtype == jnp.bfloat16
    assert jnp.allclose(out_bf16.astype(jnp.float32), ref_bf16, atol=5e-2, rtol=5e-2)

    print("KERNEL_OK")
</pallas_src>

<mosaic_0001>
module attributes {stable_mosaic.version = 11 : i64} {
  func.func @_pos_enc_kernel(%arg0: i32, %arg1: memref<8x2x128xf32, #tpu.memory_space<vmem>>, %arg2: memref<8x128xf32, #tpu.memory_space<vmem>>, %arg3: memref<8x2x128xf32, #tpu.memory_space<vmem>>) attributes {dimension_semantics = [#tpu.dimension_semantics<parallel>], iteration_bounds = array<i64: 2>, scalar_prefetch = 0 : i64, scratch_operands = 0 : i64, tpu.core_type = #tpu.core_type<tc>, window_params = [{transform_indices = @transform_0, window_bounds = array<i64: 8, 2, 128>}, {transform_indices = @transform_1, window_bounds = array<i64: 8, 128>}, {transform_indices = @transform_2, window_bounds = array<i64: 8, 2, 128>}]} {
    %c0 = arith.constant 0 : index
    %c0_0 = arith.constant 0 : index
    %c0_1 = arith.constant 0 : index
    %0 = vector.load %arg1[%c0, %c0_0, %c0_1] : memref<8x2x128xf32, #tpu.memory_space<vmem>>, vector<8x2x128xf32>
    %c0_2 = arith.constant 0 : index
    %c0_3 = arith.constant 0 : index
    %1 = vector.load %arg2[%c0_2, %c0_3] : memref<8x128xf32, #tpu.memory_space<vmem>>, vector<8x128xf32>
    %2 = vector.shape_cast %1 : vector<8x128xf32> to vector<8x1x128xf32>
    %cst = arith.constant 11.3137083 : f32
    %3 = vector.broadcast %cst : f32 to vector<8x2x128xf32>
    %4 = arith.mulf %0, %3 : vector<8x2x128xf32>
    %5 = vector.broadcast %2 : vector<8x1x128xf32> to vector<8x2x128xf32>
    %6 = arith.addf %4, %5 : vector<8x2x128xf32>
    %c0_4 = arith.constant 0 : index
    %c0_5 = arith.constant 0 : index
    %c0_6 = arith.constant 0 : index
    %7 = vector.load %arg3[%c0_4, %c0_5, %c0_6] : memref<8x2x128xf32, #tpu.memory_space<vmem>>, vector<8x2x128xf32>
    tpu.vector_store %arg3[%c0_4, %c0_5, %c0_6], %6 {strides = array<i32>} : memref<8x2x128xf32, #tpu.memory_space<vmem>>, vector<8x2x128xf32>,
    return
  }
  func.func @transform_0(%arg0: i32) -> (i32, i32, i32) {
    %c0_i32 = arith.constant 0 : i32
    %c0_i32_0 = arith.constant 0 : i32
    %c0_i32_1 = arith.constant 0 : i32
    return %arg0, %c0_i32, %c0_i32_0 : i32, i32, i32
  }
  func.func @transform_1(%arg0: i32) -> (i32, i32) {
    %c0_i32 = arith.constant 0 : i32
    %c0_i32_0 = arith.constant 0 : i32
    return %arg0, %c0_i32 : i32, i32
  }
  func.func @transform_2(%arg0: i32) -> (i32, i32, i32) {
    %c0_i32 = arith.constant 0 : i32
    %c0_i32_0 = arith.constant 0 : i32
    %c0_i32_1 = arith.constant 0 : i32
    return %arg0, %c0_i32, %c0_i32_0 : i32, i32, i32
  }
}

</mosaic_0001>

<bundles_post_ra>
// kernel: tpu_custom_call.1
= control target key start
LH: loop header
LB: loop body
LE: loop exit
PB: predicated region body
PF: predicated region fallthrough
CT: control target
= control target key end

     0   :  { %7 = vsyncpa [#allocation3], 0  ;;  %s883_s0 = inlined_call_operand.hbm [shape: f32[16,2,128], index: 0, kind: input, shape index: {}]   ;;  %s884_s1 = inlined_call_operand.hbm [shape: f32[512,128], index: 1, kind: input, shape index: {}]   ;;  %s885_s2 = inlined_call_operand.hbm [shape: f32[16,2,128], index: 2, kind: output, shape index: {}]  }
   0x1   :  { %9 = vsyncpa [#allocation3 + $0x1], 0 }
   0x2   :  { %10 = vsyncpa [#allocation6], 0 }
   0x3   :  { %12 = vsyncpa [#allocation6 + $0x1], 0 }
   0x4   :  { %13 = vsyncpa [#allocation4], 0 }
   0x5   :  { %15 = vsyncpa [#allocation4 + $0x1], 0  ;;  %s665_s9 = smov 0   ;;  %s667_s10 = smov 0  }
   0x6   :  { %s669_s11 = smov 0   ;;  %s671_s12 = smov 0  }
   0x7 LB: > { %s686_s13 = sadd.s32 4294967295, %s640_s12   ;;  %s434_s14 = sadd.s32 4294967294, %s640_s12   ;;  %s640_s12 = sphi %s671_s12, %s902_s12   ;;  %s636_s11 = sphi %s669_s11, %s901_s11   ;;  %s632_s10 = sphi %s667_s10, %s900_s10   ;;  %s628_s9 = sphi %s665_s9, %s899_s9  }
   0x8   : > { %s690_s15 = sadd.s32 1, %s640_s12   ;;  %s28_s16 = sadd.s32 1, %s636_s11 }
   0x9   : > { %s25_s17 = ssub.s32 %s640_s12, %s690_s15  ;;  %p35_p0 = scmp.ne.s32.totalorder %s636_s11, %s632_s10 }
   0xa   : > { %p26_p1 = scmp.eq.s32.totalorder %s25_s17, 0  ;;  %p36_p2 = scmp.eq.s32.totalorder %s640_s12, 0 }
   0xb   : > { %p41_p3 = scmp.ne.s32.totalorder %s632_s10, %s628_s9  ;;  %p42_p4 = scmp.eq.s32.totalorder %s686_s13, 0 }
   0xc   : > { %s702_s18 = scalar_select %p26_p1, %s636_s11, %s28_s16  }
   0xd   : > { %p704_p5 = por %p36_p2, %p35_p0  ;;  %p708_p6 = por %p42_p4, %p41_p3 }
   0xe   : > { %p91_p7 = scmp.eq.s32.totalorder %s686_s13, 1  ;;  %p97_p8 = scmp.eq.s32.totalorder %s434_s14, 1 }
   0xf   : > { %s889_s20 = scalar_select %p708_p6, 1, 0 }
  0x10   : > { %p470_p10 = scmp.lt.s32.totalorder %s640_s12, 2  ;;  %p715_p11 = por %p91_p7, %p35_p0 }
  0x11   : > { %p719_p12 = por %p97_p8, %p41_p3  ;;  %s724_s23 = sand.u32 1, %s636_s11  }
  0x12   : > { %s890_s21 = scalar_select %p715_p11, 1, 0 }
  0x13   : > { %s891_s22 = scalar_select %p719_p12, 1, 0 }
  0x14   : > { %s451_s24 = sshll.u32 %s640_s12, 8  ;;  %s437_s25 = sshll.u32 %s724_s23, 4 }
  0x15   : > { %s731_s28 = scalar_lea.hbm %s883_s0, %s451_s24  ;;  %s121_s29 = scalar_lea.vmem [#allocation2], %s437_s25 }
  0x16   : > { %s128_s30 = sshll.u32 %s121_s29, 4  ;;  %p735_p13 = pnand %p470_p10, %p704_p5  ;;  %s739_s30 = int_to_ptr.vmem [resolvable:$true] %s128_s30 }
  0x17   : > { %s118_s4 = scalar_lea.sflag [#allocation3], %s724_s23  ;;  %s510_s5 = scalar_lea.hbm %s731_s28, 256 }
  0x18   : > { %p511_p0 = scmp.ne.s32.totalorder %s731_s28, %s510_s5  ;;  %p512_p1 = pneg %p735_p13 }
  0x19   : > { %s515_s8 = scalar_lea.hbm %s883_s0, 512  ;;  %p516_p4 = scmp.lt.u32.totalorder %s731_s28, %s883_s0 }
  0x1a   : > { %p513_p2 = pnand %p512_p1, %p511_p0  ;;  %p517_p5 = scmp.lt.u32.totalorder %s515_s8, %s510_s5 }
  0x1b   : > { %p519_p8 = scmp.lt.u32.totalorder %s510_s5, %s731_s28 }
  0x1c   : > { %p514_p3 = pneg %p513_p2  ;;  %p518_p7 = por %p517_p5, %p516_p4 }
  0x1e   : > { %p520_p10 = por %p519_p8, %p518_p7 }
  0x20   : > { %p521_p9 = pnand %p520_p10, %p514_p3 }
  0x22   : > { %524 = shalt.err (!%p521_p9)
}
  0x23   : > { %s525_s17 = scalar_lea.vmem %s739_s30, 256  ;;  %s642_s19 = smov [#allocation2]  }
  0x24   : > { %p526_p0 = scmp.ne.s32.totalorder %s739_s30, %s525_s17  ;;  %s530_s24 = sshll.u32 %s642_s19, 4  ;;  %s531_s24 = int_to_ptr.vmem [resolvable:$false] %s530_s24 }
  0x25   : > { %s532_s25 = scalar_lea.vmem %s531_s24, 512  ;;  %p533_p11 = scmp.lt.s32.totalorder %s739_s30, %s531_s24 }
  0x26   : > { %p528_p2 = pnand %p526_p0, %p512_p1  ;;  %p534_p4 = scmp.lt.s32.totalorder %s532_s25, %s525_s17 }
  0x28   : > { %p529_p12 = pneg %p528_p2  ;;  %p535_p5 = por %p534_p4, %p533_p11 }
  0x2a   : > { %p536_p7 = pnand %p535_p5, %p529_p12 }
  0x2c   : > { %539 = shalt.err (!%p536_p7)
}
  0x2d   : > { %s643_s26 = smov 32   ;;  %s644_s27 = smov 2  }
  0x2e   : > { %462 = dma.hbm_to_vmem [thread:$0]  (!%p735_p13), %s731_s28, 256, %s739_s30, %s118_s4, %s643_s26, %s643_s26, %s644_s27  }
  0x2f   : > { %p442_p9 = scmp.ge.s32.totalorder %s640_s12, 1  ;;  %p154_p3 = scmp.lt.s32.totalorder %s640_s12, 3 }
  0x30   : > { %s440_s29 = sshll.u32 %s724_s23, 3  ;;  %s441_s6 = sshll.u32 %s640_s12, 7 }
  0x31   : > { %p772_p11 = pnand %p442_p9, %p154_p3  ;;  %s142_s7 = scalar_lea.vmem [#allocation5], %s440_s29 }
  0x32   : > { %s149_s8 = sshll.u32 %s142_s7, 4  ;;  %s780_s17 = scalar_lea.hbm %s884_s1, %s441_s6  ;;  %s150_s8 = int_to_ptr.vmem [resolvable:$true] %s149_s8 }
  0x33   : > { %s893_s5 = scalar_select %p772_p11, 1, 0 }
  0x34   : > { %s139_s28 = scalar_lea.sflag [#allocation6], %s724_s23  ;;  %s540_s30 = scalar_lea.hbm %s780_s17, 128 }
  0x35   : > { %p541_p12 = scmp.ne.s32.totalorder %s780_s17, %s540_s30  ;;  %s545_s24 = scalar_lea.hbm %s884_s1, 8192 }
  0x36   : > { %p546_p0 = scmp.lt.u32.totalorder %s780_s17, %s884_s1  ;;  %p547_p2 = scmp.lt.u32.totalorder %s545_s24, %s540_s30 }
  0x37   : > { %p543_p8 = pnand %p541_p12, %p512_p1  ;;  %p549_p5 = scmp.lt.u32.totalorder %s540_s30, %s780_s17 }
  0x38   : > { %p548_p4 = por %p547_p2, %p546_p0 }
  0x39   : > { %p544_p10 = pneg %p543_p8 }
  0x3a   : > { %p550_p7 = por %p549_p5, %p548_p4 }
  0x3c   : > { %p551_p9 = pnand %p550_p7, %p544_p10 }
  0x3e   : > { %554 = shalt.err (!%p551_p9)
}
  0x3f   : > { %s555_s23 = scalar_lea.vmem %s150_s8, 128  ;;  %s645_s27 = smov [#allocation5]  }
  0x40   : > { %p556_p3 = scmp.ne.s32.totalorder %s150_s8, %s555_s23  ;;  %s560_s29 = sshll.u32 %s645_s27, 4  ;;  %s561_s29 = int_to_ptr.vmem [resolvable:$false] %s560_s29 }
  0x41   : > { %s562_s6 = scalar_lea.vmem %s561_s29, 256  ;;  %p563_p6 = scmp.lt.s32.totalorder %s150_s8, %s561_s29 }
  0x42   : > { %p558_p12 = pnand %p556_p3, %p512_p1  ;;  %p564_p11 = scmp.lt.s32.totalorder %s562_s6, %s555_s23 }
  0x44   : > { %p559_p8 = pneg %p558_p12  ;;  %p565_p0 = por %p564_p11, %p563_p6 }
  0x46   : > { %p566_p2 = pnand %p565_p0, %p559_p8 }
  0x48   : > { %569 = shalt.err (!%p566_p2)
}
  0x49   : > { %465 = dma.hbm_to_vmem [thread:$0]  (!%p735_p13), %s780_s17, 128, %s150_s8, %s139_s28  }
  0x4a   : > { %p894_p10 = scmp.ne.s32.totalorder %s893_s5, 0 }
  0x4b   : > { %s805_s7 = sand.u32 (!%p894_p10), 1, %s632_s10   ;;  %p895_p6 = scmp.ne.s32.totalorder (!%p894_p10), %s889_s20, 0 }
  0x4c   : > { %158 = sbr.rel (%p894_p10) target bundleno = 122 (0x7a), region = 28  ;;  %s443_s14 = sshll.u32 (!%p894_p10), %s805_s7, 4 }
  0x4d   : > { %s161_s16 = scalar_lea.sflag (!%p894_p10), [#allocation3], %s805_s7  ;;  %s811_s30 = scalar_lea.vmem (!%p894_p10), [#allocation2], %s443_s14 }
  0x53   : > { %615 = dma.done.wait (%p895_p6), %s161_s16, 256  }
  0x54   : > { %617 = vsyncadd (%p895_p6), %s161_s16, 4294967040  ;;  %s444_s3 = sshll.u32 %s805_s7, 3  ;;  %s170_s5 = scalar_lea.sflag [#allocation6], %s805_s7 }
  0x55   : > { %s173_s8 = scalar_lea.vmem [#allocation5], %s444_s3 }
  0x56   : > { %619 = dma.done.wait (%p895_p6), %s170_s5, 128  }
  0x57   : > { %621 = vsyncadd (%p895_p6), %s170_s5, 4294967168  ;;  %v215_v0 = vlaneseq  ;;  %v646_v1 = vmov 1966171168   ;;  %v201_v6 = vld [vmem:[%s811_s30] sm:$0x3]  ;;  %s198_s20 = scalar_lea.vmem [#allocation7], %s443_s14 }
  0x58   : > { %v213_v2 = vunpack.c.l.s4 %v646_v1  ;;  %v209_v7 = vld [vmem:[%s173_s8] sm:$0xff]  ;;  %v260_v15 = vmul.f32 11.313708, %v201_v6  ;;  %v205_v17 = vld [vmem:[%s811_s30 + $0x8] sm:$0x3]  ;;  %s338_s17 = sshll.u32 %s198_s20, 4  ;;  %s834_s17 = int_to_ptr.vmem [resolvable:$true] %s338_s17 }
  0x59   : > { %v216_v3 = vshrl.u32 %v215_v0, 7  ;;  %v202_v10 = vld [vmem:[%s811_s30 + $0x2] sm:$0x3]  ;;  %v203_v11 = vld [vmem:[%s811_s30 + $0x4] sm:$0x3]  ;;  %v211_v12 = vcombine.high %v209_v7, %v209_v7  ;;  %s452_s28 = sshll.u32 %s686_s13, 8 }
  0x5a   : > { %v214_v4 = vunpack.c.0.s8 %v213_v2  ;;  %v204_v13 = vld [vmem:[%s811_s30 + $0x6] sm:$0x3]  ;;  %v206_v19 = vld [vmem:[%s811_s30 + $0xa] sm:$0x3]  ;;  %v261_v20 = vmul.f32 11.313708, %v202_v10  ;;  %s839_s24 = scalar_lea.hbm %s885_s2, %s452_s28 }
  0x5b   : > { %v270_v9 = vsub.s32 0, %v216_v3  ;;  %v262_v21 = vmul.f32 11.313708, %v203_v11  ;;  %v263_v22 = vmul.f32 11.313708, %v204_v13  ;;  %s325_s13 = scalar_lea.sflag [#allocation4], %s805_s7 }
  0x5c   : > { %v217_v5 = vsub.s32 %v214_v4, %v216_v3  ;;  %v207_v27 = vld [vmem:[%s811_s30 + $0xc] sm:$0x3]  ;;  %v264_v28 = vmul.f32 11.313708, %v205_v17  ;;  %v265_v30 = vmul.f32 11.313708, %v206_v19 }
  0x5d   : > { %v208_v31 = vld [vmem:[%s811_s30 + $0xe] sm:$0x3]  ;;  %v266_v39 = vmul.f32 11.313708, %v207_v27  ;;  %s570_s25 = scalar_lea.vmem %s834_s17, 256  ;;  %p896_p1 = scmp.ne.s32.totalorder %s890_s21, 0 }
  0x5e   : > { %v218_v8 = vrot.slane %v209_v7, %v217_v5  ;;  %v225_v18 = vrot.slane %v211_v12, %v217_v5  ;;  %v267_v43 = vmul.f32 11.313708, %v208_v31  ;;  %p571_p13 = scmp.ne.s32.totalorder %s834_s17, %s570_s25  ;;  %s647_s26 = smov [#allocation7]  }
  0x5f   : > { %s574_s23 = sshll.u32 %s647_s26, 4  ;;  %s575_s23 = int_to_ptr.vmem [resolvable:$false] %s574_s23 }
  0x60   : > { %v234_v14 = vrot.slane %v218_v8, %v217_v5  ;;  %v226_v16 = vcombine.high %v218_v8, %v218_v8  ;;  %v241_v26 = vrot.slane %v225_v18, %v217_v5  ;;  %v227_v29 = vcombine.high %v225_v18, %v225_v18  ;;  %p572_p11 = pnand %p571_p13, %p896_p1  ;;  %s576_s27 = scalar_lea.vmem %s575_s23, 512 }
  0x61   : > { %p577_p5 = scmp.lt.s32.totalorder %s834_s17, %s575_s23  ;;  %p578_p7 = scmp.lt.s32.totalorder %s576_s27, %s570_s25 }
  0x62   : > { %v271_v23 = vrot.slane %v234_v14, %v270_v9  ;;  %v248_v24 = vrot.slane %v226_v16, %v217_v5  ;;  %v256_v25 = vcombine.high %v234_v14, %v234_v14  ;;  %v287_v36 = vrot.slane %v241_v26, %v270_v9  ;;  %p573_p4 = pneg %p572_p11 }
  0x63   : > { %v255_v37 = vrot.slane %v227_v29, %v217_v5  ;;  %v257_v38 = vcombine.high %v241_v26, %v241_v26  ;;  %p579_p9 = por %p578_p7, %p577_p5 }
  0x64   : > { %v308_v32 = vadd.f32 %v271_v23, %v260_v15  ;;  %v275_v33 = vrot.slane %v248_v24, %v270_v9  ;;  %v279_v34 = vrot.slane %v256_v25, %v270_v9  ;;  %v258_v35 = vcombine.high %v248_v24, %v248_v24 }
  0x65   : > { %v312_v44 = vadd.f32 %v287_v36, %v264_v28  ;;  %v291_v45 = vrot.slane %v255_v37, %v270_v9  ;;  %v295_v46 = vrot.slane %v257_v38, %v270_v9  ;;  %v259_v47 = vcombine.high %v255_v37, %v255_v37  ;;  %p580_p3 = pnand %p579_p9, %p573_p4 }
  0x66   : > { %316 = vst [vmem:[%s198_s20] sm:$0x3] %v308_v32  ;;  %v309_v40 = vadd.f32 %v275_v33, %v261_v20  ;;  %v310_v41 = vadd.f32 %v279_v34, %v262_v21  ;;  %v283_v42 = vrot.slane %v258_v35, %v270_v9 }
  0x67   : > { %320 = vst [vmem:[%s198_s20 + $0x8] sm:$0x3] %v312_v44  ;;  %v313_v49 = vadd.f32 %v291_v45, %v265_v30  ;;  %v314_v50 = vadd.f32 %v295_v46, %v266_v39  ;;  %v299_v51 = vrot.slane %v259_v47, %v270_v9 }
  0x68   : > { %317 = vst [vmem:[%s198_s20 + $0x2] sm:$0x3] %v309_v40  ;;  %318 = vst [vmem:[%s198_s20 + $0x4] sm:$0x3] %v310_v41  ;;  %v311_v48 = vadd.f32 %v283_v42, %v263_v22 }
  0x69   : > { %321 = vst [vmem:[%s198_s20 + $0xa] sm:$0x3] %v313_v49  ;;  %322 = vst [vmem:[%s198_s20 + $0xc] sm:$0x3] %v314_v50  ;;  %v315_v52 = vadd.f32 %v299_v51, %v267_v43 }
  0x6a   : > { %319 = vst [vmem:[%s198_s20 + $0x6] sm:$0x3] %v311_v48 }
  0x6b   : > { %323 = vst [vmem:[%s198_s20 + $0xe] sm:$0x3] %v315_v52 }
  0x6c   : > { %583 = shalt.err (!%p580_p3)
}
  0x6d   : > { %s584_s29 = scalar_lea.hbm %s839_s24, 256  ;;  %s588_s16 = scalar_lea.hbm %s885_s2, 512 }
  0x6e   : > { %p585_p12 = scmp.ne.s32.totalorder %s839_s24, %s584_s29  ;;  %p589_p2 = scmp.lt.u32.totalorder %s839_s24, %s885_s2 }
  0x6f   : > { %p590_p10 = scmp.lt.u32.totalorder %s588_s16, %s584_s29  ;;  %p592_p13 = scmp.lt.u32.totalorder %s584_s29, %s839_s24 }
  0x70   : > { %p586_p8 = pnand %p585_p12, %p896_p1 }
  0x71   : > { %p591_p6 = por %p590_p10, %p589_p2 }
  0x72   : > { %p587_p0 = pneg %p586_p8 }
  0x73   : > { %p593_p11 = por %p592_p13, %p591_p6 }
  0x75   : > { %p594_p4 = pnand %p593_p11, %p587_p0 }
  0x77   : > { %597 = shalt.err (!%p594_p4)
}
  0x78   : > { %s648_s5 = smov 32   ;;  %s649_s8 = smov 2  }
  0x79   : > { %457 = dma.vmem_to_hbm [thread:$0]  (%p896_p1), %s834_s17, 256, %s839_s24, %s325_s13, %s648_s5, %s648_s5, %s649_s8  }
  0x7a PF: > { %s353_s20 = sand.u32 1, %s628_s9   ;;  %p897_p5 = scmp.ne.s32.totalorder %s891_s22, 0 }
  0x7b   : > { %p898_p7 = scmp.ge.s32.totalorder %s640_s12, 2  ;;  %s354_s28 = scalar_lea.sflag [#allocation4], %s353_s20 }
  0x7d   : > { %p467_p9 = pnand %p898_p7, %p897_p5 }
  0x7f   : > { %623 = dma.done.wait (!%p467_p9), %s354_s28, 256  }
  0x80   : > { %625 = vsyncadd (!%p467_p9), %s354_s28, 4294967040  ;;  %p18_p3 = scmp.ge.s32.totalorder %s690_s15, 4   ;;  %s899_s9 = smov %s632_s10 }
  0x81   : > { %s900_s10 = smov %s636_s11  ;;  %s901_s11 = smov %s702_s18 }
  0x82   : > { %s902_s12 = smov %s690_s15  ;;  %20 = sbr.rel (!%p18_p3) target bundleno = 7 (0x7), region = 86 }
  0x89   :  { %359 = vsyncpa [#allocation3], 1 }
  0x8a   :  { %361 = vsyncpa [#allocation3 + $0x1], 1 }
  0x8b   :  { %362 = vsyncpa [#allocation6], 1 }
  0x8c   :  { %364 = vsyncpa [#allocation6 + $0x1], 1 }
  0x8d   :  { %365 = vsyncpa [#allocation4], 1 }
  0x8e   :  { %367 = vsyncpa [#allocation4 + $0x1], 1 }

</bundles_post_ra>
